<compile_context>
chip_gen: v7x
topology: tpu7x:2x2x1
jax: 0.10.0
libtpu: 0.0.40
codegen_flags: <defaults>
</compile_context>

<pallas_src>
import math

import jax
import jax.numpy as jnp
from jax.experimental import pallas as pl
from jax.experimental.pallas import tpu as pltpu

# 0.5 * (1 + tanh(z)) == sigmoid(2z); fold the 2 into the constants.
_K = 2.0 * math.sqrt(2.0 / math.pi)   # 2 * sqrt(2/pi)
_KA = _K * 0.044715                   # 2 * sqrt(2/pi) * 0.044715


def _gelu_kernel(x_ref, o_ref):
    x = x_ref[...]
    xf = x.astype(jnp.float32)           # compute in f32 (no-op for f32 inputs)
    t = xf * xf
    inner = xf * (_K + _KA * t)          # == 2*sqrt(2/pi)*(x + 0.044715*x^3)
    o_ref[...] = (xf * jax.nn.sigmoid(inner)).astype(o_ref.dtype)


def gelu_pallas(x, *, target_lane_width=8192, target_block_bytes=4 * 1024 * 1024):
    """Tanh-approx GELU (GPT-2 style). Accepts any shape/dtype."""
    orig_shape = x.shape
    dtype = x.dtype

    n = 1
    for d in orig_shape:
        n *= d
    if n == 0:
        return x

    flat = x.reshape(n)

    # Only pad a tiny tail (and only when needed) so the flat length is a
    # multiple of 128; avoids a full extra HBM pass for common shapes.
    n_pad = (-n) % 128
    if n_pad:
        flat = jnp.pad(flat, (0, n_pad))
    n_tot = n + n_pad

    # Lane width C: largest (power-of-two x 128) <= target that divides the
    # flattened length, so the reshape is pure metadata (no data movement).
    c = 128
    while c * 2 <= target_lane_width and n_tot % (c * 2) == 0:
        c *= 2
    rows = n_tot // c
    x2d = flat.reshape(rows, c)

    # Sublane multiple depends on dtype packing: f32 -> 8, bf16 -> 16, i8 -> 32.
    itemsize = jnp.dtype(dtype).itemsize
    sub_mult = 8 * max(1, 4 // itemsize)

    if rows <= sub_mult:
        # Block equals the full (small) row extent — always a legal block shape.
        row_tile = rows
    else:
        bytes_per_row = c * itemsize
        row_tile = max(1, target_block_bytes // bytes_per_row)
        row_tile = min(row_tile, rows)
        row_tile = max(sub_mult, (row_tile // sub_mult) * sub_mult)

    grid = (pl.cdiv(rows, row_tile),)

    out2d = pl.pallas_call(
        _gelu_kernel,
        out_shape=jax.ShapeDtypeStruct((rows, c), dtype),
        grid_spec=pltpu.PrefetchScalarGridSpec(
            num_scalar_prefetch=0,
            grid=grid,
            in_specs=[pl.BlockSpec((row_tile, c), lambda i: (i, 0))],
            out_specs=pl.BlockSpec((row_tile, c), lambda i: (i, 0)),
        ),
        compiler_params=pltpu.CompilerParams(
            dimension_semantics=("parallel",),
            # Above v5e's 16 MiB default, equal to v6e/v7x defaults, and well
            # under v7x's 64 MiB physical VMEM. Pipeline footprint ~16 MiB.
            vmem_limit_bytes=32 * 1024 * 1024,
        ),
    )(x2d)

    out_flat = out2d.reshape(n_tot)
    if n_pad:
        out_flat = out_flat[:n]
    return out_flat.reshape(orig_shape)


def gelu_ref(x):
    return 0.5 * x * (1.0 + jnp.tanh(
        jnp.sqrt(2.0 / jnp.pi) * (x + 0.044715 * jnp.power(x, 3))))


if __name__ == "__main__":
    key = jax.random.PRNGKey(0)

    # GPT-style activation input: (batch=2, seq=8, hidden=32), f32.
    x = jax.random.normal(key, (2, 8, 32), dtype=jnp.float32)
    out = jax.block_until_ready(gelu_pallas(x))
    ref = gelu_ref(x)
    assert out.shape == x.shape and out.dtype == x.dtype
    assert jnp.allclose(out, ref, atol=1e-5, rtol=1e-5)

    # Exercise the non-128-divisible tail-pad path as well.
    x2 = jax.random.normal(jax.random.PRNGKey(1), (2, 8, 33), dtype=jnp.float32)
    out2 = jax.block_until_ready(gelu_pallas(x2))
    assert out2.shape == x2.shape and out2.dtype == x2.dtype
    assert jnp.allclose(out2, gelu_ref(x2), atol=1e-5, rtol=1e-5)

    # A larger, multi-block shape to exercise the pipelined/megacore path.
    x3 = jax.random.normal(jax.random.PRNGKey(2), (4, 256, 1024), dtype=jnp.float32)
    out3 = jax.block_until_ready(gelu_pallas(x3))
    assert jnp.allclose(out3, gelu_ref(x3), atol=1e-5, rtol=1e-5)

    print("KERNEL_OK")
</pallas_src>

<mosaic_0001>
module attributes {stable_mosaic.version = 11 : i64} {
  func.func @_gelu_kernel(%arg0: i32, %arg1: memref<1x512xf32, #tpu.memory_space<vmem>>, %arg2: memref<1x512xf32, #tpu.memory_space<vmem>>) attributes {dimension_semantics = [#tpu.dimension_semantics<parallel>], iteration_bounds = array<i64: 1>, scalar_prefetch = 0 : i64, scratch_operands = 0 : i64, tpu.core_type = #tpu.core_type<tc>, window_params = [{transform_indices = @transform_0, window_bounds = array<i64: 1, 512>}, {transform_indices = @transform_1, window_bounds = array<i64: 1, 512>}]} {
    %c0 = arith.constant 0 : index
    %c0_0 = arith.constant 0 : index
    %0 = vector.load %arg1[%c0, %c0_0] : memref<1x512xf32, #tpu.memory_space<vmem>>, vector<1x512xf32>
    %1 = arith.mulf %0, %0 : vector<1x512xf32>
    %cst = arith.constant 0.0713548139 : f32
    %2 = vector.broadcast %cst : f32 to vector<1x512xf32>
    %3 = arith.mulf %2, %1 : vector<1x512xf32>
    %cst_1 = arith.constant 1.59576917 : f32
    %4 = vector.broadcast %cst_1 : f32 to vector<1x512xf32>
    %5 = arith.addf %4, %3 : vector<1x512xf32>
    %6 = arith.mulf %0, %5 : vector<1x512xf32>
    %7 = arith.negf %6 : vector<1x512xf32>
    %8 = math.exp %7 : vector<1x512xf32>
    %cst_2 = arith.constant 1.000000e+00 : f32
    %9 = vector.broadcast %cst_2 : f32 to vector<1x512xf32>
    %10 = arith.addf %9, %8 : vector<1x512xf32>
    %11 = arith.divf %9, %10 : vector<1x512xf32>
    %12 = arith.mulf %0, %11 : vector<1x512xf32>
    %c0_3 = arith.constant 0 : index
    %c0_4 = arith.constant 0 : index
    %13 = vector.load %arg2[%c0_3, %c0_4] : memref<1x512xf32, #tpu.memory_space<vmem>>, vector<1x512xf32>
    tpu.vector_store %arg2[%c0_3, %c0_4], %12 {strides = array<i32>} : memref<1x512xf32, #tpu.memory_space<vmem>>, vector<1x512xf32>,
    return
  }
  func.func @transform_0(%arg0: i32) -> (i32, i32) {
    %c0_i32 = arith.constant 0 : i32
    %c0_i32_0 = arith.constant 0 : i32
    return %arg0, %c0_i32 : i32, i32
  }
  func.func @transform_1(%arg0: i32) -> (i32, i32) {
    %c0_i32 = arith.constant 0 : i32
    %c0_i32_0 = arith.constant 0 : i32
    return %arg0, %c0_i32 : i32, i32
  }
}

</mosaic_0001>

<bundles_post_ra>
// kernel: tpu_custom_call.1
= control target key start
LH: loop header
LB: loop body
LE: loop exit
PB: predicated region body
PF: predicated region fallthrough
CT: control target
= control target key end

     0   :  { %6 = vsyncpa [#allocation3], 0  ;;  %s144_s0 = inlined_call_operand.hbm [shape: f32[1,512], index: 0, kind: input, shape index: {}]   ;;  %s145_s1 = inlined_call_operand.hbm [shape: f32[1,512], index: 1, kind: output, shape index: {}]  }
   0x1   :  { %7 = vsyncpa [#allocation4], 0  ;;  %s108_s6 = smov [#allocation2]   ;;  %s60_s10 = scalar_lea.hbm %s144_s0, 64 }
   0x2   :  { %s14_s7 = sshll.u32 %s108_s6, 4  ;;  %p61_p0 = scmp.ne.s32.totalorder %s144_s0, %s60_s10  ;;  %s15_s7 = int_to_ptr.vmem [resolvable:$true] %s14_s7 }
   0x3   :  { %p64_p1 = scmp.lt.u32.totalorder %s60_s10, %s144_s0 }
   0x5   :  { %p66_p2 = pnand %p64_p1, %p61_p0 }
   0x7   :  { %69 = shalt.err (!%p66_p2)
}
   0x8   :  { %s70_s15 = scalar_lea.vmem %s15_s7, 64  ;;  %p75_p4 = scmp.lt.s32.totalorder %s15_s7, %s15_s7 }
   0x9   :  { %p71_p3 = scmp.ne.s32.totalorder %s15_s7, %s70_s15  ;;  %p76_p5 = scmp.lt.s32.totalorder %s70_s15, %s70_s15 }
   0xb   :  { %p77_p6 = por %p76_p5, %p75_p4 }
   0xd   :  { %p78_p7 = pnand %p77_p6, %p71_p3 }
   0xf   :  { %81 = shalt.err (!%p78_p7)
}
  0x10   :  { %17 = dma.hbm_to_vmem [thread:$0]  %s144_s0, 64, %s15_s7, [#allocation3]  }
  0x11   :  { %104 = dma.done.wait [#allocation3], 64  }
  0x12   :  { %105 = vsyncadd [#allocation3], 4294967232  ;;  %v21_v0 = vld [vmem:[#allocation2] sm:$0xf]  ;;  %v33_v8 = vlaneseq  ;;  %s109_s18 = smov [#allocation5]  }
  0x13   :  { %v22_v1 = vmul.f32 %v21_v0, %v21_v0  ;;  %s44_s19 = sshll.u32 %s109_s18, 4  ;;  %s45_s19 = int_to_ptr.vmem [resolvable:$true] %s44_s19 }
  0x14   :  { %vm35_vm0 = vcmp.lt.s32.totalorder %v33_v8, 512  ;;  %s82_s0 = scalar_lea.vmem %s45_s19, 64  ;;  %p87_p9 = scmp.lt.s32.totalorder %s45_s19, %s45_s19 }
  0x15   :  { %v23_v2 = vmul.f32 0.071354814, %v22_v1  ;;  %p83_p8 = scmp.ne.s32.totalorder %s45_s19, %s82_s0  ;;  %p88_p10 = scmp.lt.s32.totalorder %s82_s0, %s82_s0 }
  0x17   :  { %v24_v3 = vadd.f32 1.5957692, %v23_v2  ;;  %p89_p11 = por %p88_p10, %p87_p9 }
  0x19   :  { %v25_v4 = vmul.f32 %v24_v3, %v21_v0  ;;  %p90_p12 = pnand %p89_p11, %p83_p8 }
  0x1b   :  { %v53_v5 = vmul.f32 -1.442695, %v25_v4 }
  0x1d   :  { %56 = vpow2.f32 %v53_v5 }
  0x27   :  { %v57_v6 = vpop.eup %56 }
  0x28   :  { %v29_v7 = vadd.f32 1.0, %v57_v6 }
  0x2a   :  { %58 = vrcp.f32 %v29_v7 }
  0x34   :  { %v59_v9 = vpop.eup %58 }
  0x35   :  { %v32_v10 = vmul.f32 %v59_v9, %v21_v0 }
  0x37   :  { %37 = vst.msk [vmem:[#allocation5] sm:$0xf] %vm35_vm0, %v32_v10 }
  0x38   :  { %93 = shalt.err (!%p90_p12)
}
  0x39   :  { %s94_s22 = scalar_lea.hbm %s145_s1, 64 }
  0x3a   :  { %p95_p13 = scmp.ne.s32.totalorder %s145_s1, %s94_s22  ;;  %p98_p0 = scmp.lt.u32.totalorder %s94_s22, %s145_s1 }
  0x3c   :  { %p100_p1 = pnand %p98_p0, %p95_p13 }
  0x3e   :  { %103 = shalt.err (!%p100_p1)
}
  0x3f   :  { %47 = dma.vmem_to_hbm [thread:$0]  %s45_s19, 64, %s145_s1, [#allocation4]  }
  0x40   :  { %106 = dma.done.wait [#allocation4], 64  }
  0x41   :  { %107 = vsyncadd [#allocation4], 4294967232 }
  0x42   :  { %51 = vsyncpa [#allocation3], 1 }
  0x43   :  { %52 = vsyncpa [#allocation4], 1 }

</bundles_post_ra>
